<compile_context>
chip_gen: v5e
topology: v5e:2x2
jax: 0.10.0
libtpu: 0.0.40
codegen_flags: <defaults>
</compile_context>

<pallas_src>
import jax
import jax.numpy as jnp
from jax.experimental import pallas as pl
from jax.experimental.pallas import tpu as pltpu

_LANES = 1024          # lane-dense last dim (multiple of 128)
_MAX_TILE_ROWS = 256   # 256 x 1024 x 4B = 1 MiB per f32 block


def _identity_kernel(x_ref, o_ref):
    # Pure pass-through: the abstract forward defines no computation.
    o_ref[...] = x_ref[...]


@jax.jit
def module_with_mask_forward(x: jax.Array) -> jax.Array:
    """Identity forward matching the (abstract) ModuleWithMask contract.

    Accepts any shape/dtype; returns an array of identical shape/dtype/values.
    """
    orig_shape = x.shape
    total = x.size
    flat = x.reshape(-1)

    # Lane-dense 2D layout: last dim is a large multiple of 128.
    cols = _LANES
    rows = pl.cdiv(total, cols)

    # Tile selection: big blocks (~1 MiB), but never the unbounded
    # whole-array-in-one-block fallback for large inputs.
    if rows <= _MAX_TILE_ROWS:
        # Single block whose sublane dim equals the full array dim (allowed
        # even when not a multiple of 8).
        tile_rows = rows
    else:
        tile_rows = _MAX_TILE_ROWS

    rows_padded = pl.cdiv(rows, tile_rows) * tile_rows
    padded_total = rows_padded * cols
    if padded_total != total:
        flat = jnp.pad(flat, (0, padded_total - total))
    x2d = flat.reshape(rows_padded, cols)

    grid = (rows_padded // tile_rows,)
    bytes_accessed = 2 * padded_total * x.dtype.itemsize

    out2d = pl.pallas_call(
        _identity_kernel,
        out_shape=jax.ShapeDtypeStruct((rows_padded, cols), x.dtype),
        grid_spec=pltpu.PrefetchScalarGridSpec(
            num_scalar_prefetch=0,
            grid=grid,
            in_specs=[pl.BlockSpec((tile_rows, cols), lambda i: (i, 0))],
            out_specs=pl.BlockSpec((tile_rows, cols), lambda i: (i, 0)),
        ),
        compiler_params=pltpu.CompilerParams(
            dimension_semantics=("parallel",),   # shards across v7x's 2 TCs
            vmem_limit_bytes=32 * 1024 * 1024,   # headroom on v5e's 16 MiB default
        ),
        input_output_aliases={0: 0},             # identity: write in place
        cost_estimate=pl.CostEstimate(
            flops=0, transcendentals=0, bytes_accessed=bytes_accessed),
    )(x2d)

    return out2d.reshape(-1)[:total].reshape(orig_shape)


if __name__ == "__main__":
    key = jax.random.PRNGKey(0)
    # Small NCHW input consistent with a conv-style module: batch=2, ch=4, 16x16.
    x = jax.random.normal(key, (2, 4, 16, 16), dtype=jnp.float32)

    y = module_with_mask_forward(x)
    jax.block_until_ready(y)

    # Identity semantics check (abstract forward -> pass-through).
    assert y.shape == x.shape and y.dtype == x.dtype
    assert bool(jnp.allclose(y, x))

    print("KERNEL_OK")
</pallas_src>

<mosaic_0001>
module attributes {stable_mosaic.version = 11 : i64} {
  func.func @_identity_kernel(%arg0: i32, %arg1: memref<2x1024xf32, #tpu.memory_space<vmem>>, %arg2: memref<2x1024xf32, #tpu.memory_space<vmem>>) attributes {dimension_semantics = [#tpu.dimension_semantics<parallel>], iteration_bounds = array<i64: 1>, scalar_prefetch = 0 : i64, scratch_operands = 0 : i64, tpu.core_type = #tpu.core_type<tc>, window_params = [{transform_indices = @transform_0, window_bounds = array<i64: 2, 1024>}, {transform_indices = @transform_1, window_bounds = array<i64: 2, 1024>}]} {
    %c0 = arith.constant 0 : index
    %c0_0 = arith.constant 0 : index
    %0 = vector.load %arg1[%c0, %c0_0] : memref<2x1024xf32, #tpu.memory_space<vmem>>, vector<2x1024xf32>
    %c0_1 = arith.constant 0 : index
    %c0_2 = arith.constant 0 : index
    %1 = vector.load %arg2[%c0_1, %c0_2] : memref<2x1024xf32, #tpu.memory_space<vmem>>, vector<2x1024xf32>
    tpu.vector_store %arg2[%c0_1, %c0_2], %0 {strides = array<i32>} : memref<2x1024xf32, #tpu.memory_space<vmem>>, vector<2x1024xf32>,
    return
  }
  func.func @transform_0(%arg0: i32) -> (i32, i32) {
    %c0_i32 = arith.constant 0 : i32
    %c0_i32_0 = arith.constant 0 : i32
    return %arg0, %c0_i32 : i32, i32
  }
  func.func @transform_1(%arg0: i32) -> (i32, i32) {
    %c0_i32 = arith.constant 0 : i32
    %c0_i32_0 = arith.constant 0 : i32
    return %arg0, %c0_i32 : i32, i32
  }
}

</mosaic_0001>

<bundles_post_ra>
// kernel: module_with_mask_forward.1
= control target key start
LH: loop header
LB: loop body
LE: loop exit
PB: predicated region body
PF: predicated region fallthrough
CT: control target
= control target key end

     0   :  { %s38_s0 = inlined_call_operand.vmem [shape: f32[2,1024], index: 0, kind: input, shape index: {}, may-alias: {0,1}]   ;;  %s39_s1 = inlined_call_operand.vmem [shape: f32[2,1024], index: 1, kind: output, shape index: {}, may-alias: {0,1}]  }
   0x1   :  { %v8_v0 = vld [vmem:[%s38_s0] sm:$0xff]  ;;  %v9_v1 = vld [vmem:[%s38_s0 + $0x8] sm:$0xff] }
   0x2   :  { %10 = vst [vmem:[%s39_s1] sm:$0xff] %v8_v0 }
   0x3   :  { %11 = vst [vmem:[%s39_s1 + $0x8] sm:$0xff] %v9_v1 }

</bundles_post_ra>
